<compile_context>
chip_gen: v5e
topology: v5e:2x2
jax: 0.10.0
libtpu: 0.0.40
codegen_flags: <defaults>
</compile_context>

<pallas_src>
import jax
import jax.numpy as jnp
from jax import lax
from jax.experimental import pallas as pl
from jax.experimental.pallas import tpu as pltpu

# ---- config (stand-in for __C) ------------------------------------------------
DATASET = "vqa"
B = 2          # batch
N = 8          # number of frcn objects (seq)
F = 32         # frcn feature size
BBOX_DIM = 5   # bbox feature size (x1, y1, x2, y2, area)
E = 16         # BBOXFEAT_EMB_SIZE (folded away before the kernel)
H = 128        # HIDDEN_SIZE stand-in (real OpenVQA uses 512) — lane-dense output
KP = 128       # packed K dim: frcn (F) + bbox (5) + bias (1) + zero padding


def feat_filter(dataset, img, frcn_feat, grid_feat, bbox_feat):
    feat_dict = {}
    if dataset == "vqa":
        feat_dict["FRCN_FEAT"] = frcn_feat
        feat_dict["BBOX_FEAT"] = bbox_feat
    elif dataset == "gqa":
        feat_dict["FRCN_FEAT"] = frcn_feat
        feat_dict["GRID_FEAT"] = grid_feat
        feat_dict["BBOX_FEAT"] = bbox_feat
    elif dataset == "clevr":
        feat_dict["GRID_FEAT"] = grid_feat
    return feat_dict


# ---- Pallas kernel -------------------------------------------------------------
def adapter_kernel(x_ref, w_ref, img_ref, mask_ref):
    # x_ref : (M, KP)  packed [frcn | bbox | 1 | 0]   (M = B*N, KP = 128)
    # w_ref : (KP, H)  packed [Wf1 ; Wb@Wf2 ; bb@Wf2+bf ; 0]
    x = x_ref[...]

    # Single MXU pass: frcn@Wf1 + bbox@(Wb@Wf2) + 1*(bb@Wf2+bf), f32 accumulate.
    img = jnp.dot(x, w_ref[...], preferred_element_type=jnp.float32)   # (M, H)
    img_ref[...] = img.astype(img_ref.dtype)

    # make_mask: abs-sum over the frcn lanes only (lanes [0, F)).  Use an iota
    # select instead of x[:, :F] so no sub-(8,128)-tile slice is materialized;
    # the reduce runs on the XLU (otherwise-idle slot).
    lane = lax.broadcasted_iota(jnp.int32, x.shape, dimension=1)        # (M, KP)
    s = jnp.sum(jnp.where(lane < F, jnp.abs(x), 0.0), axis=-1, keepdims=True)
    mask_ref[...] = (s == 0.0).astype(jnp.int32)                        # (M, 1)


@jax.jit
def base_adapter_forward(img, frcn_feat, grid_feat, bbox_feat, params):
    """Mirrors BaseAdapter.forward for DATASET='vqa' (dispatch + vqa_forward)."""
    feat_dict = feat_filter(DATASET, img, frcn_feat, grid_feat, bbox_feat)
    frcn = feat_dict["FRCN_FEAT"]          # (B, N, F)   f32
    bbox = feat_dict["BBOX_FEAT"]          # (B, N, 5)   f32
    wb, bb, wf1, wf2, bf = params
    M = B * N

    # Fold the bbox-embedding linear (exact same math, different rounding order):
    #   (bbox @ Wb + bb) @ Wf2 + bf == bbox @ (Wb @ Wf2) + (bb @ Wf2 + bf)
    wcomb = wb @ wf2                        # (5, H)
    bcomb = bb @ wf2 + bf                   # (1, H)

    # Pack activations + bias column into the existing 128-lane padding
    # (flatten done here, in XLA, so the kernel never reshapes).
    x_flat = frcn.reshape(M, F)
    b_flat = bbox.reshape(M, BBOX_DIM)
    ones = jnp.ones((M, 1), jnp.float32)
    x_pad = jnp.zeros((M, KP - F - BBOX_DIM - 1), jnp.float32)
    x_pack = jnp.concatenate([x_flat, b_flat, ones, x_pad], axis=-1)    # (M, KP)

    w_pad = jnp.zeros((KP - F - BBOX_DIM - 1, H), jnp.float32)
    w_pack = jnp.concatenate([wf1, wcomb, bcomb, w_pad], axis=0)        # (KP, H)

    img_flat, mask_col = pl.pallas_call(
        adapter_kernel,
        out_shape=(
            jax.ShapeDtypeStruct((M, H), jnp.float32),
            jax.ShapeDtypeStruct((M, 1), jnp.int32),
        ),
        # No grid: one invocation, 2 input DMAs, everything resident in VMEM
        # (tiny).  See the header for the production tiling plan.
        in_specs=[
            pl.BlockSpec(memory_space=pltpu.MemorySpace.VMEM),
            pl.BlockSpec(memory_space=pltpu.MemorySpace.VMEM),
        ],
        out_specs=(
            pl.BlockSpec(memory_space=pltpu.MemorySpace.VMEM),
            pl.BlockSpec(memory_space=pltpu.MemorySpace.VMEM),
        ),
    )(x_pack, w_pack)

    img_feat = img_flat.reshape(B, N, H)
    # img_feat_mask shaped like make_mask(): (B, 1, 1, N) boolean
    img_feat_mask = (mask_col != 0).reshape(B, 1, 1, N)
    return img_feat, img_feat_mask


# ---- reference (plain JAX, mirrors the original module math) -------------------
def reference_forward(frcn, bbox, params):
    wb, bb, wf1, wf2, bf = params
    bbox_emb = bbox @ wb + bb
    img = frcn @ wf1 + bbox_emb @ wf2 + bf
    mask = (jnp.sum(jnp.abs(frcn), axis=-1) == 0).reshape(B, 1, 1, N)
    return img, mask


if __name__ == "__main__":
    key = jax.random.PRNGKey(0)
    k1, k2, k3, k4, k5, k6 = jax.random.split(key, 6)

    # deterministic "parameters" (synthetic init, not a checkpoint load)
    # TODO(synk): nn.init / checkpoint loading has no Pallas equivalent; synthetic weights used.
    wb = jax.random.normal(k1, (BBOX_DIM, E), jnp.float32) * 0.1
    bb = jax.random.normal(k2, (1, E), jnp.float32) * 0.01
    wf1 = jax.random.normal(k3, (F, H), jnp.float32) * 0.1
    wf2 = jax.random.normal(k4, (E, H), jnp.float32) * 0.1
    bf = jax.random.normal(k5, (1, H), jnp.float32) * 0.01
    params = (wb, bb, wf1, wf2, bf)

    # inputs (img / grid_feat unused by the vqa branch; passed for signature parity)
    img = jnp.zeros((B, 3, 16, 16), jnp.float32)
    grid_feat = jnp.zeros((B, N, F), jnp.float32)
    frcn_feat = jax.random.normal(k6, (B, N, F), jnp.float32)
    # zero-pad last two objects of batch 1 so the mask path is exercised
    frcn_feat = frcn_feat.at[1, -2:, :].set(0.0)
    bbox_feat = jax.random.uniform(jax.random.PRNGKey(7), (B, N, BBOX_DIM), jnp.float32)

    img_feat, img_mask = base_adapter_forward(img, frcn_feat, grid_feat, bbox_feat, params)
    img_feat = jax.block_until_ready(img_feat)
    img_mask = jax.block_until_ready(img_mask)

    ref_feat, ref_mask = reference_forward(frcn_feat, bbox_feat, params)
    assert img_feat.shape == (B, N, H)
    assert img_mask.shape == (B, 1, 1, N) and img_mask.dtype == jnp.bool_
    assert jnp.allclose(img_feat, ref_feat, atol=1e-4, rtol=1e-4)
    assert bool(jnp.all(img_mask == ref_mask))

    print("KERNEL_OK")
</pallas_src>

<mosaic_0001>
module attributes {stable_mosaic.version = 11 : i64} {
  func.func @adapter_kernel(%arg0: memref<16x128xf32, #tpu.memory_space<vmem>>, %arg1: memref<128x128xf32, #tpu.memory_space<vmem>>, %arg2: memref<16x128xf32, #tpu.memory_space<vmem>>, %arg3: memref<16x1xi32, #tpu.memory_space<vmem>>) attributes {dimension_semantics = [], scalar_prefetch = 0 : i64, scratch_operands = 0 : i64, tpu.core_type = #tpu.core_type<tc>} {
    %c0 = arith.constant 0 : index
    %c0_0 = arith.constant 0 : index
    %0 = vector.load %arg0[%c0, %c0_0] : memref<16x128xf32, #tpu.memory_space<vmem>>, vector<16x128xf32>
    %c0_1 = arith.constant 0 : index
    %c0_2 = arith.constant 0 : index
    %1 = vector.load %arg1[%c0_1, %c0_2] : memref<128x128xf32, #tpu.memory_space<vmem>>, vector<128x128xf32>
    %cst = arith.constant dense<0.000000e+00> : vector<16x128xf32>
    %2 = tpu.matmul %0, %1, %cst {dimension_numbers = #tpu.dot_dimension_numbers<[1], [0], [0], [1], [0, 0, 1, 1], [], []>} : vector<16x128xf32>, vector<128x128xf32>, vector<16x128xf32> -> vector<16x128xf32>
    %c0_3 = arith.constant 0 : index
    %c0_4 = arith.constant 0 : index
    %3 = vector.load %arg2[%c0_3, %c0_4] : memref<16x128xf32, #tpu.memory_space<vmem>>, vector<16x128xf32>
    tpu.vector_store %arg2[%c0_3, %c0_4], %2 {strides = array<i32>} : memref<16x128xf32, #tpu.memory_space<vmem>>, vector<16x128xf32>,
    %4 = tpu.iota {dimensions = array<i32: 1>} : vector<16x128xi32>
    %c32_i32 = arith.constant 32 : i32
    %5 = vector.broadcast %c32_i32 : i32 to vector<16x128xi32>
    %6 = arith.cmpi slt, %4, %5 : vector<16x128xi32>
    %7 = math.absf %0 : vector<16x128xf32>
    %cst_5 = arith.constant 0.000000e+00 : f32
    %8 = vector.broadcast %cst_5 : f32 to vector<16x128xf32>
    %9 = arith.select %6, %7, %8 : vector<16x128xi1>, vector<16x128xf32>
    %cst_6 = arith.constant dense<0.000000e+00> : vector<16xf32>
    %10 = vector.multi_reduction <add>, %9, %cst_6 [1] : vector<16x128xf32> to vector<16xf32>
    %11 = vector.shape_cast %10 : vector<16xf32> to vector<16x1xf32>
    %cst_7 = arith.constant 0.000000e+00 : f32
    %12 = vector.broadcast %cst_7 : f32 to vector<16x1xf32>
    %13 = arith.cmpf oeq, %11, %12 : vector<16x1xf32>
    %14 = arith.extui %13 : vector<16x1xi1> to vector<16x1xi32>
    %c0_8 = arith.constant 0 : index
    %c0_9 = arith.constant 0 : index
    %15 = vector.load %arg3[%c0_8, %c0_9] : memref<16x1xi32, #tpu.memory_space<vmem>>, vector<16x1xi32>
    tpu.vector_store %arg3[%c0_8, %c0_9], %14 {strides = array<i32>} : memref<16x1xi32, #tpu.memory_space<vmem>>, vector<16x1xi32>,
    return
  }
}

</mosaic_0001>

<bundles_post_ra>
// kernel: base_adapter_forward.1
= control target key start
LH: loop header
LB: loop body
LE: loop exit
PB: predicated region body
PF: predicated region fallthrough
CT: control target
= control target key end

     0   :  { %v57_v2 = vlaneseq  ;;  %s232_s0 = inlined_call_operand.vmem [shape: f32[16,128], index: 0, kind: input, shape index: {}]   ;;  %s233_s1 = inlined_call_operand.vmem [shape: f32[128,128], index: 1, kind: input, shape index: {}]   ;;  %s234_s2 = inlined_call_operand.hbm [shape: f32[16,128], index: 2, kind: output, shape index: {0}]   ;;  %s235_s3 = inlined_call_operand.vmem [shape: s32[16,1], index: 3, kind: output, shape index: {1}]  }
   0x1   :  { %v31_v0 = vld [vmem:[%s233_s1 + $0x78] sm:$0xff]  ;;  %v30_v1 = vld [vmem:[%s233_s1 + $0x70] sm:$0xff]  ;;  %v29_v3 = vld [vmem:[%s233_s1 + $0x68] sm:$0xff] }
   0x2   :  { %32 = vmatpush.msra.mxu0 %v31_v0  ;;  %97 = vmatpush.msra.mxu1 %v31_v0  ;;  %v58_v4 = vand.u32 127, %v57_v2  ;;  %v28_v5 = vld [vmem:[%s233_s1 + $0x60] sm:$0xff]  ;;  %v27_v7 = vld [vmem:[%s233_s1 + $0x58] sm:$0xff] }
   0x3   :  { %v14_v6 = vld [vmem:[%s232_s0] sm:$0xff] }
   0x4   :  { %33 = vmatpush.msra.mxu0 %v30_v1  ;;  %98 = vmatpush.msra.mxu1 %v30_v1  ;;  %vm59_vm0 = vcmp.lt.s32.totalorder %v58_v4, 32  ;;  %v60_v8 = vand.u32 2147483647, %v14_v6 }
   0x6   :  { %34 = vmatpush.msra.mxu0 %v29_v3  ;;  %99 = vmatpush.msra.mxu1 %v29_v3 }
   0x7   :  { %9 = vsyncpa [#allocation3], 0  ;;  %v26_v9 = vld [vmem:[%s233_s1 + $0x50] sm:$0xff]  ;;  %v62_v10 = vsel %vm59_vm0, %v60_v8, 0.0  ;;  %v25_v11 = vld [vmem:[%s233_s1 + $0x48] sm:$0xff]  ;;  %vm72_vm1 = vcmask 7168  }
   0x8   :  { %35 = vmatpush.msra.mxu0 %v28_v5  ;;  %100 = vmatpush.msra.mxu1 %v28_v5  ;;  %v15_v12 = vld [vmem:[%s232_s0 + $0x8] sm:$0xff]  ;;  %v24_v14 = vld [vmem:[%s233_s1 + $0x40] sm:$0xff]  ;;  %v23_v15 = vld [vmem:[%s233_s1 + $0x38] sm:$0xff]  ;;  %v143_v25 = vmov 0   ;;  %s144_s23 = smov [#allocation2]   ;;  %s81_s27 = sshll.u32 %s234_s2, 4  ;;  %s82_s27 = int_to_ptr.hbm [resolvable:$true] %s81_s27 }
   0x9   :  { %64 = vadd.xlane.f32.xlu0 %v62_v10  ;;  %v61_v13 = vand.u32 2147483647, %v15_v12  ;;  %v22_v17 = vld [vmem:[%s233_s1 + $0x30] sm:$0xff]  ;;  %v21_v18 = vld [vmem:[%s233_s1 + $0x28] sm:$0xff]  ;;  %v20_v19 = vld [vmem:[%s233_s1 + $0x20] sm:$0xff]  ;;  %s79_s24 = sshll.u32 %s144_s23, 4  ;;  %s80_s24 = int_to_ptr.vmem [resolvable:$true] %s79_s24 }
   0xa   :  { %36 = vmatpush.msra.mxu0 %v27_v7  ;;  %101 = vmatpush.msra.mxu1 %v27_v7  ;;  %v19_v20 = vld [vmem:[%s233_s1 + $0x18] sm:$0xff]  ;;  %v18_v21 = vld [vmem:[%s233_s1 + $0x10] sm:$0xff]  ;;  %v17_v22 = vld [vmem:[%s233_s1 + $0x8] sm:$0xff]  ;;  %s145_s28 = smov 128   ;;  %s146_s29 = smov 8  }
   0xb   :  { %v63_v16 = vsel %vm59_vm0, %v61_v13, 0.0  ;;  %v16_v23 = vld [vmem:[%s233_s1] sm:$0xff] }
   0xc   :  { %37 = vmatpush.msra.mxu0 %v26_v9  ;;  %102 = vmatpush.msra.mxu1 %v26_v9 }
   0xe   :  { %38 = vmatpush.msra.mxu0 %v25_v11  ;;  %103 = vmatpush.msra.mxu1 %v25_v11 }
  0x10   :  { %39 = vmatpush.msra.mxu0 %v24_v14  ;;  %104 = vmatpush.msra.mxu1 %v24_v14 }
  0x11   :  { %66 = vadd.xlane.f32.xlu0 %v63_v16 }
  0x12   :  { %40 = vmatpush.msra.mxu0 %v23_v15  ;;  %105 = vmatpush.msra.mxu1 %v23_v15 }
  0x14   :  { %41 = vmatpush.msra.mxu0 %v22_v17  ;;  %106 = vmatpush.msra.mxu1 %v22_v17 }
  0x16   :  { %42 = vmatpush.msra.mxu0 %v21_v18  ;;  %107 = vmatpush.msra.mxu1 %v21_v18 }
  0x18   :  { %43 = vmatpush.msra.mxu0 %v20_v19  ;;  %108 = vmatpush.msra.mxu1 %v20_v19 }
  0x1a   :  { %44 = vmatpush.msra.mxu0 %v19_v20  ;;  %109 = vmatpush.msra.mxu1 %v19_v20 }
  0x1c   :  { %45 = vmatpush.msra.mxu0 %v18_v21  ;;  %110 = vmatpush.msra.mxu1 %v18_v21 }
  0x1e   :  { %46 = vmatpush.msra.mxu0 %v17_v22  ;;  %111 = vmatpush.msra.mxu1 %v17_v22 }
  0x20   :  { %47 = vmatpush.msra.mxu0 %v16_v23  ;;  %112 = vmatpush.msra.mxu1 %v16_v23 }
  0x21   :  { %48 = vmatmul.f32.vlgmr.msra.gmra.mxu0 %v14_v6  ;;  %51 = vmatmul.f32.vlgmr.msra.gmra.mxu1 %v15_v12 }
  0x7c   :  { %v65_v24 = vpop.xlane.xlu0 %64 }
  0x7d   :  { %vm68_vm2 = vcmp.eq.f32.partialorder %v65_v24, 0.0 }
  0x7e   :  { %v70_v26 = vsel %vm68_vm2, 1, %v143_v25 }
  0x7f   :  { %73 = vst.msk [vmem:[%s235_s3] sm:$0xff] %vm72_vm1, %v70_v26 }
  0x84   :  { %v67_v27 = vpop.xlane.xlu0 %66 }
  0x85   :  { %vm69_vm3 = vcmp.eq.f32.partialorder %v67_v27, 0.0 }
  0x86   :  { %v71_v28 = vsel %vm69_vm3, 1, %v143_v25 }
  0x87   :  { %74 = vst.msk [vmem:[%s235_s3 + $0x8] sm:$0xff] %vm72_vm1, %v71_v28 }
  0x9e   :  { %v49_v29 = vpop.f32.mrf.mxu0  ;;  %v52_v30 = vpop.f32.mrf.mxu1 }
  0x9f   :  { %55 = vst [vmem:[#allocation2] sm:$0xff] %v49_v29 }
  0xa0   :  { %56 = vst [vmem:[#allocation2 + $0x8] sm:$0xff] %v52_v30 }
  0xa1   :  { %87 = dma.vmem_to_hbm [thread:$0]  %s80_s24, 256, %s82_s27, [#allocation3], %s145_s28, %s145_s28, %s146_s29  }
  0xa2   :  { %141 = dma.done.wait [#allocation3], 256  }
  0xa3   :  { %142 = vsyncadd [#allocation3], 4294967040 }
  0xa4   :  { %96 = vsyncpa [#allocation3], 1 }

</bundles_post_ra>
